<compile_context>
chip_gen: v6e
topology: v6e:2x2x1
jax: 0.10.0
libtpu: 0.0.40
codegen_flags: <defaults>
</compile_context>

<pallas_src>
import jax
import jax.numpy as jnp
from jax import lax
from jax.experimental import pallas as pl
from jax.experimental.pallas import tpu as pltpu


# ---------------------------------------------------------------------------
# Config (small, deterministic)
# ---------------------------------------------------------------------------
IMG_SIZE = 16
PATCH_SIZE = 4
IN_CHANNELS = 3
DIM_MODEL = 32

NUM_PATCHES = (IMG_SIZE // PATCH_SIZE) ** 2            # 16
PATCH_DIM = PATCH_SIZE * PATCH_SIZE * IN_CHANNELS      # 48
SEQ_LEN = NUM_PATCHES + 1                              # 17

FOLD = 8                                               # patch rows folded into lanes
K_FOLD = FOLD * PATCH_DIM                              # 384 = 3 * 128 lanes
N_FOLD = FOLD * DIM_MODEL                              # 256 lanes (matches 256-wide MXU)
ROWS_PER_BATCH = NUM_PATCHES // FOLD                   # 2 folded rows per image

MAX_TB = 1024      # max images per grid step  -> x block 1.5 MiB, out block 1 MiB (bf16)
SMALL_B = 64       # below this, use a single grid step (best on single-TC chips)


# ---------------------------------------------------------------------------
# Pallas kernel: lane-dense folded matmul + fused (bias + pos) add, bf16 store
# ---------------------------------------------------------------------------
def _embed_body_kernel(x_ref, w_ref, add_ref, o_ref):
    # x_ref  : (TMF, 384) bf16   8 patches folded into lanes, TMF folded rows
    # w_ref  : (384, 256) bf16   block-diagonal weight (8 copies of W^T)
    # add_ref: (2, 256)   f32    folded (bias + pos[1:])  -- period-2 row pattern
    # o_ref  : (TMF, 256) bf16
    acc = jnp.dot(x_ref[...], w_ref[...], preferred_element_type=jnp.float32)

    add = add_ref[...]                                        # (2, 256) f32
    rows = lax.broadcasted_iota(jnp.int32, acc.shape, 0)
    even = (rows & 1) == 0
    add0 = jnp.broadcast_to(add[0:1, :], acc.shape)
    add1 = jnp.broadcast_to(add[1:2, :], acc.shape)
    # f32 add, single downcast on the final store.
    o_ref[...] = (acc + jnp.where(even, add0, add1)).astype(o_ref.dtype)


def embed_body(x_fold, w_bd, add_fold, tm_f):
    """x_fold: [M_f, 384] bf16 -> [M_f, 256] bf16 (M_f = B_pad * 2 folded rows)."""
    M_f = x_fold.shape[0]
    grid = (M_f // tm_f,)
    flops = 2 * M_f * K_FOLD * N_FOLD                         # actual MXU work
    bytes_accessed = (x_fold.size * x_fold.dtype.itemsize
                      + w_bd.size * w_bd.dtype.itemsize
                      + add_fold.size * add_fold.dtype.itemsize
                      + M_f * N_FOLD * 2)                     # bf16 output
    return pl.pallas_call(
        _embed_body_kernel,
        out_shape=jax.ShapeDtypeStruct((M_f, N_FOLD), jnp.bfloat16),
        grid_spec=pltpu.PrefetchScalarGridSpec(
            num_scalar_prefetch=0,
            grid=grid,
            in_specs=[
                pl.BlockSpec((tm_f, K_FOLD), lambda i: (i, 0)),
                pl.BlockSpec((K_FOLD, N_FOLD), lambda i: (0, 0)),
                pl.BlockSpec((ROWS_PER_BATCH, N_FOLD), lambda i: (0, 0)),
            ],
            out_specs=pl.BlockSpec((tm_f, N_FOLD), lambda i: (i, 0)),
        ),
        compiler_params=pltpu.CompilerParams(
            dimension_semantics=("parallel",),
            vmem_limit_bytes=32 * 1024 * 1024),
        cost_estimate=pl.CostEstimate(
            flops=flops, transcendentals=0, bytes_accessed=bytes_accessed),
    )(x_fold, w_bd, add_fold)


# ---------------------------------------------------------------------------
# Module forward (patchify + fold + kernel + tiny class-token epilogue)
# ---------------------------------------------------------------------------
def embedding_module(images_nchw, weight, bias, class_weight, pos_embedding):
    """NCHW float images -> [B, SEQ_LEN, DIM_MODEL] bf16 (z0 in the ViT paper)."""
    B = images_nchw.shape[0]

    # --- batch blocking -----------------------------------------------------
    if B <= SMALL_B:
        TB = B                                   # single grid step
    else:
        TB = min(MAX_TB, -(-B // 2))             # >= 2 "parallel" steps (v7x megacore)
        TB = -(-TB // 4) * 4                     # tm_f = 2*TB must be a multiple of 8
    B_pad = -(-B // TB) * TB
    tm_f = ROWS_PER_BATCH * TB                   # folded rows per grid step

    # --- patchify + bf16 cast + lane-fold + pad (one XLA fusion) -------------
    h = IMG_SIZE // PATCH_SIZE
    x = images_nchw.reshape(B, IN_CHANNELS, h, PATCH_SIZE, h, PATCH_SIZE)
    x = jnp.transpose(x.astype(jnp.bfloat16), (0, 2, 4, 3, 5, 1))   # b h w p1 p2 c
    x_fold = x.reshape(B * ROWS_PER_BATCH, K_FOLD)                  # free reshape
    if B_pad != B:
        x_fold = jnp.pad(x_fold, ((0, (B_pad - B) * ROWS_PER_BATCH), (0, 0)))

    # --- parameters: block-diag weight + folded (bias + pos[1:]) add block ---
    w_bd = jnp.kron(jnp.eye(FOLD, dtype=jnp.float32),
                    jnp.transpose(weight)).astype(jnp.bfloat16)     # (384, 256)
    pos = pos_embedding.reshape(SEQ_LEN, DIM_MODEL).astype(jnp.float32)
    add_fold = (pos[1:, :] + bias[None, :].astype(jnp.float32)
                ).reshape(ROWS_PER_BATCH, N_FOLD)                   # (2, 256) f32

    body = embed_body(x_fold, w_bd, add_fold, tm_f)                 # (B_pad*2, 256) bf16
    body = body.reshape(B_pad, NUM_PATCHES, DIM_MODEL)[:B]          # free reshape + fused slice

    # Batch-invariant class row (class_weight + pos[0]); small fused epilogue.
    cls_row = (class_weight.reshape(1, DIM_MODEL).astype(jnp.float32)
               + pos[:1, :]).astype(jnp.bfloat16)
    cls = jnp.broadcast_to(cls_row[None, :, :], (B, 1, DIM_MODEL))
    return jnp.concatenate([cls, body], axis=1)                     # (B, 17, 32) bf16


# ---------------------------------------------------------------------------
# Parameter init (matches nn.Linear / xavier_uniform_ of the PyTorch module)
# ---------------------------------------------------------------------------
def xavier_uniform(key, shape, fan_in, fan_out):
    a = jnp.sqrt(6.0 / (fan_in + fan_out))
    return jax.random.uniform(key, shape, jnp.float32, -a, a)


def init_params(key):
    k_w, k_b, k_cls, k_pos = jax.random.split(key, 4)
    bound = 1.0 / jnp.sqrt(PATCH_DIM)
    weight = jax.random.uniform(k_w, (DIM_MODEL, PATCH_DIM), jnp.float32, -bound, bound)
    bias = jax.random.uniform(k_b, (DIM_MODEL,), jnp.float32, -bound, bound)
    class_weight = xavier_uniform(k_cls, (1, 1, DIM_MODEL), 1, DIM_MODEL)
    pos_embedding = xavier_uniform(k_pos, (1, SEQ_LEN, DIM_MODEL), SEQ_LEN, DIM_MODEL)
    return weight, bias, class_weight, pos_embedding


# ---------------------------------------------------------------------------
# Plain-JAX reference (f32 math on bf16-cast inputs — the accepted precision)
# ---------------------------------------------------------------------------
def patchify_ref(images_nchw):
    B, C, H, W = images_nchw.shape
    h, w = H // PATCH_SIZE, W // PATCH_SIZE
    x = images_nchw.reshape(B, C, h, PATCH_SIZE, w, PATCH_SIZE)
    x = jnp.transpose(x, (0, 2, 4, 3, 5, 1))
    return x.reshape(B, h * w, PATCH_SIZE * PATCH_SIZE * C)


def reference(images, weight, bias, class_weight, pos_embedding):
    B = images.shape[0]
    p_bf = patchify_ref(images).astype(jnp.bfloat16).astype(jnp.float32)
    w_bf = weight.astype(jnp.bfloat16).astype(jnp.float32)
    emb = p_bf @ w_bf.T + bias
    cls = jnp.broadcast_to(class_weight, (B, 1, DIM_MODEL))
    return jnp.concatenate([cls, emb], axis=1) + pos_embedding


# ---------------------------------------------------------------------------
if __name__ == "__main__":
    key = jax.random.PRNGKey(0)
    k_img, k_img2, k_params = jax.random.split(key, 3)
    weight, bias, class_weight, pos_embedding = init_params(k_params)

    fwd = jax.jit(embedding_module)

    # --- small batch (single grid step) ---
    B = 2
    images = jax.random.uniform(k_img, (B, IN_CHANNELS, IMG_SIZE, IMG_SIZE), jnp.float32)
    z = jax.block_until_ready(fwd(images, weight, bias, class_weight, pos_embedding))
    z_ref = reference(images, weight, bias, class_weight, pos_embedding)
    assert z.shape == (B, SEQ_LEN, DIM_MODEL), z.shape
    err = float(jnp.max(jnp.abs(z.astype(jnp.float32) - z_ref)))
    assert err < 2e-2, err

    # --- larger batch (multi-step "parallel" grid + batch padding path) ---
    B2 = 100
    images2 = jax.random.uniform(k_img2, (B2, IN_CHANNELS, IMG_SIZE, IMG_SIZE), jnp.float32)
    z2 = jax.block_until_ready(fwd(images2, weight, bias, class_weight, pos_embedding))
    z2_ref = reference(images2, weight, bias, class_weight, pos_embedding)
    assert z2.shape == (B2, SEQ_LEN, DIM_MODEL), z2.shape
    err2 = float(jnp.max(jnp.abs(z2.astype(jnp.float32) - z2_ref)))
    assert err2 < 2e-2, err2

    print("KERNEL_OK")
</pallas_src>

<mosaic_0001>
module attributes {stable_mosaic.version = 11 : i64} {
  func.func @_embed_body_kernel(%arg0: i32, %arg1: memref<4x384xbf16, #tpu.memory_space<vmem>>, %arg2: memref<384x256xbf16, #tpu.memory_space<vmem>>, %arg3: memref<2x256xf32, #tpu.memory_space<vmem>>, %arg4: memref<4x256xbf16, #tpu.memory_space<vmem>>) attributes {dimension_semantics = [#tpu.dimension_semantics<parallel>], iteration_bounds = array<i64: 1>, scalar_prefetch = 0 : i64, scratch_operands = 0 : i64, tpu.core_type = #tpu.core_type<tc>, window_params = [{transform_indices = @transform_0, window_bounds = array<i64: 4, 384>}, {pipeline_mode = #tpu.pipeline_mode<synchronous>, transform_indices = @transform_1, window_bounds = array<i64: 384, 256>}, {pipeline_mode = #tpu.pipeline_mode<synchronous>, transform_indices = @transform_2, window_bounds = array<i64: 2, 256>}, {transform_indices = @transform_3, window_bounds = array<i64: 4, 256>}]} {
    %c0 = arith.constant 0 : index
    %c0_0 = arith.constant 0 : index
    %0 = vector.load %arg1[%c0, %c0_0] : memref<4x384xbf16, #tpu.memory_space<vmem>>, vector<4x384xbf16>
    %c0_1 = arith.constant 0 : index
    %c0_2 = arith.constant 0 : index
    %1 = vector.load %arg2[%c0_1, %c0_2] : memref<384x256xbf16, #tpu.memory_space<vmem>>, vector<384x256xbf16>
    %cst = arith.constant dense<0.000000e+00> : vector<4x256xf32>
    %2 = tpu.matmul %0, %1, %cst {dimension_numbers = #tpu.dot_dimension_numbers<[1], [0], [0], [1], [0, 0, 1, 1], [], []>} : vector<4x384xbf16>, vector<384x256xbf16>, vector<4x256xf32> -> vector<4x256xf32>
    %c0_3 = arith.constant 0 : index
    %c0_4 = arith.constant 0 : index
    %3 = vector.load %arg3[%c0_3, %c0_4] : memref<2x256xf32, #tpu.memory_space<vmem>>, vector<2x256xf32>
    %4 = tpu.iota {dimensions = array<i32: 0>} : vector<4x256xi32>
    %c1_i32 = arith.constant 1 : i32
    %5 = vector.broadcast %c1_i32 : i32 to vector<4x256xi32>
    %6 = arith.andi %4, %5 : vector<4x256xi32>
    %c0_i32 = arith.constant 0 : i32
    %7 = vector.broadcast %c0_i32 : i32 to vector<4x256xi32>
    %8 = arith.cmpi eq, %6, %7 : vector<4x256xi32>
    %9 = vector.extract_strided_slice %3 {offsets = [0, 0], sizes = [1, 256], strides = [1, 1]} : vector<2x256xf32> to vector<1x256xf32>
    %10 = vector.shape_cast %9 : vector<1x256xf32> to vector<1x256xf32>
    %11 = vector.broadcast %10 : vector<1x256xf32> to vector<4x256xf32>
    %12 = vector.extract_strided_slice %3 {offsets = [1, 0], sizes = [1, 256], strides = [1, 1]} : vector<2x256xf32> to vector<1x256xf32>
    %13 = vector.shape_cast %12 : vector<1x256xf32> to vector<1x256xf32>
    %14 = vector.broadcast %13 : vector<1x256xf32> to vector<4x256xf32>
    %15 = arith.select %8, %11, %14 : vector<4x256xi1>, vector<4x256xf32>
    %16 = arith.addf %2, %15 : vector<4x256xf32>
    %17 = arith.truncf %16 : vector<4x256xf32> to vector<4x256xbf16>
    %c0_5 = arith.constant 0 : index
    %c0_6 = arith.constant 0 : index
    %18 = vector.load %arg4[%c0_5, %c0_6] : memref<4x256xbf16, #tpu.memory_space<vmem>>, vector<4x256xbf16>
    tpu.vector_store %arg4[%c0_5, %c0_6], %17 {strides = array<i32>} : memref<4x256xbf16, #tpu.memory_space<vmem>>, vector<4x256xbf16>,
    return
  }
  func.func @transform_0(%arg0: i32) -> (i32, i32) {
    %c0_i32 = arith.constant 0 : i32
    %c0_i32_0 = arith.constant 0 : i32
    return %arg0, %c0_i32 : i32, i32
  }
  func.func @transform_1(%arg0: i32) -> (i32, i32) {
    %c0_i32 = arith.constant 0 : i32
    %c0_i32_0 = arith.constant 0 : i32
    %c0_i32_1 = arith.constant 0 : i32
    return %c0_i32, %c0_i32_0 : i32, i32
  }
  func.func @transform_2(%arg0: i32) -> (i32, i32) {
    %c0_i32 = arith.constant 0 : i32
    %c0_i32_0 = arith.constant 0 : i32
    %c0_i32_1 = arith.constant 0 : i32
    return %c0_i32, %c0_i32_0 : i32, i32
  }
  func.func @transform_3(%arg0: i32) -> (i32, i32) {
    %c0_i32 = arith.constant 0 : i32
    %c0_i32_0 = arith.constant 0 : i32
    return %arg0, %c0_i32 : i32, i32
  }
}

</mosaic_0001>

<bundles_post_ra>
// kernel: embedding_module.1
= control target key start
LH: loop header
LB: loop body
LE: loop exit
PB: predicated region body
PF: predicated region fallthrough
CT: control target
= control target key end

     0   :  { %v593_v1 = vmov 0   ;;  %v65_v21 = vlaneseq  ;;  %v594_v22 = vmov 1983009808   ;;  %s776_s1 = inlined_call_operand.vmem [shape: bf16[384,256], index: 1, kind: input, shape index: {}]   ;;  %s777_s0 = inlined_call_operand.vmem [shape: bf16[4,384], index: 0, kind: input, shape index: {}]   ;;  %s778_s2 = inlined_call_operand.vmem [shape: f32[2,256], index: 2, kind: input, shape index: {}]   ;;  %s779_s3 = inlined_call_operand.vmem [shape: bf16[4,256], index: 3, kind: output, shape index: {}]  }
   0x1   :  { %v520_v0 = vld [vmem:[%s776_s1 + $0x74] ss:$8 sps:$4 sm:$0xff]   ;;  %441 = vmatprep.mubr.bf16.mxu1 %v593_v1  ;;  %v522_v2 = vld [vmem:[%s776_s1 + $0x70] ss:$8 sps:$4 sm:$0xff]   ;;  %v523_v3 = vld [vmem:[%s776_s1 + $0x64] ss:$8 sps:$4 sm:$0xff]   ;;  %v111_v23 = vunpack.c.l.s4 %v594_v22 }
   0x2   :  { %368 = vmatprep.subr.bf16.mxu0 %v520_v0  ;;  %v525_v4 = vld [vmem:[%s776_s1 + $0x60] ss:$8 sps:$4 sm:$0xff]   ;;  %v526_v5 = vld [vmem:[%s776_s1 + $0x54] ss:$8 sps:$4 sm:$0xff]   ;;  %v528_v6 = vld [vmem:[%s776_s1 + $0x50] ss:$8 sps:$4 sm:$0xff]  }
   0x3   :  { %369 = vmatpush1.bf16.msra.mxu0 %v522_v2  ;;  %v529_v7 = vld [vmem:[%s776_s1 + $0x44] ss:$8 sps:$4 sm:$0xff]   ;;  %v531_v8 = vld [vmem:[%s776_s1 + $0x40] ss:$8 sps:$4 sm:$0xff]   ;;  %v543_v9 = vld [vmem:[%s776_s1 + $0x174] ss:$8 sps:$4 sm:$0xff]   ;;  %v112_v29 = vunpack.c.0.s8 %v111_v23 }
   0x4   :  { %370 = vmatprep.subr.bf16.mxu0 %v523_v3  ;;  %v546_v10 = vld [vmem:[%s776_s1 + $0x170] ss:$8 sps:$4 sm:$0xff]   ;;  %v532_v11 = vld [vmem:[%s776_s1 + $0x34] ss:$8 sps:$4 sm:$0xff]   ;;  %409 = vmatprep.subr.bf16.mxu1 %v543_v9  ;;  %v549_v12 = vld [vmem:[%s776_s1 + $0x164] ss:$8 sps:$4 sm:$0xff]  }
   0x5   :  { %410 = vmatpush1.bf16.msra.mxu1 %v546_v10  ;;  %v552_v13 = vld [vmem:[%s776_s1 + $0x160] ss:$8 sps:$4 sm:$0xff]   ;;  %v534_v14 = vld [vmem:[%s776_s1 + $0x30] ss:$8 sps:$4 sm:$0xff]   ;;  %v535_v15 = vld [vmem:[%s776_s1 + $0x24] ss:$8 sps:$4 sm:$0xff]  }
   0x6   :  { %411 = vmatprep.subr.bf16.mxu1 %v549_v12  ;;  %v555_v16 = vld [vmem:[%s776_s1 + $0x154] ss:$8 sps:$4 sm:$0xff]   ;;  %v558_v17 = vld [vmem:[%s776_s1 + $0x150] ss:$8 sps:$4 sm:$0xff]   ;;  %v537_v18 = vld [vmem:[%s776_s1 + $0x20] ss:$8 sps:$4 sm:$0xff]  }
   0x7   :  { %371 = vmatpush1.bf16.msra.mxu0 %v525_v4  ;;  %v561_v19 = vld [vmem:[%s776_s1 + $0x144] ss:$8 sps:$4 sm:$0xff]   ;;  %v538_v20 = vld [vmem:[%s776_s1 + $0x14] ss:$8 sps:$4 sm:$0xff]   ;;  %v540_v24 = vld [vmem:[%s776_s1 + $0x10] ss:$8 sps:$4 sm:$0xff]  }
   0x8   :  { %372 = vmatprep.subr.bf16.mxu0 %v526_v5  ;;  %v564_v25 = vld [vmem:[%s776_s1 + $0x140] ss:$8 sps:$4 sm:$0xff]   ;;  %v567_v26 = vld [vmem:[%s776_s1 + $0x134] ss:$8 sps:$4 sm:$0xff]   ;;  %v541_v27 = vld [vmem:[%s776_s1 + $0x4] ss:$8 sps:$4 sm:$0xff]  }
   0x9   :  { %412 = vmatpush1.bf16.msra.mxu1 %v552_v13  ;;  %v687_v28 = vshrl.u32 %v65_v21, 7  ;;  %v570_v30 = vld [vmem:[%s776_s1 + $0x130] ss:$8 sps:$4 sm:$0xff]   ;;  %v545_v31 = vld [vmem:[%s776_s1] ss:$8 sps:$4 sm:$0xff]  }
   0xa   :  { %413 = vmatprep.subr.bf16.mxu1 %v555_v16  ;;  %v573_v32 = vld [vmem:[%s776_s1 + $0x124] ss:$8 sps:$4 sm:$0xff]   ;;  %v547_v33 = vld [vmem:[%s776_s1 + $0xf4] ss:$8 sps:$4 sm:$0xff]   ;;  %v551_v35 = vld [vmem:[%s776_s1 + $0xf0] ss:$8 sps:$4 sm:$0xff]  }
   0xb   :  { %373 = vmatpush1.bf16.msra.mxu0 %v528_v6  ;;  %v115_v34 = vsub.s32 %v112_v29, %v687_v28  ;;  %v576_v36 = vld [vmem:[%s776_s1 + $0x120] ss:$8 sps:$4 sm:$0xff]   ;;  %v579_v37 = vld [vmem:[%s776_s1 + $0x114] ss:$8 sps:$4 sm:$0xff]   ;;  %v553_v39 = vld [vmem:[%s776_s1 + $0xe4] ss:$8 sps:$4 sm:$0xff]  }
   0xc   :  { %374 = vmatprep.subr.bf16.mxu0 %v529_v7  ;;  %v15_v38 = vld [vmem:[%s777_s0] sm:$0x3f]  ;;  %v582_v41 = vld [vmem:[%s776_s1 + $0x110] ss:$8 sps:$4 sm:$0xff]   ;;  %v559_v45 = vld [vmem:[%s776_s1 + $0xd4] ss:$8 sps:$4 sm:$0xff]  }
   0xd   :  { %414 = vmatpush1.bf16.msra.mxu1 %v558_v17  ;;  %v116_v40 = vrot.slane %v15_v38, %v115_v34  ;;  %v557_v43 = vld [vmem:[%s776_s1 + $0xe0] ss:$8 sps:$4 sm:$0xff]   ;;  %v585_v44 = vld [vmem:[%s776_s1 + $0x104] ss:$8 sps:$4 sm:$0xff]   ;;  %v109_v46 = vcombine.high %v15_v38, %v15_v38  ;;  %v563_v48 = vld [vmem:[%s776_s1 + $0xd0] ss:$8 sps:$4 sm:$0xff]  }
   0xe   :  { %415 = vmatprep.subr.bf16.mxu1 %v561_v19  ;;  %v588_v47 = vld [vmem:[%s776_s1 + $0x100] ss:$8 sps:$4 sm:$0xff]   ;;  %v565_v49 = vld [vmem:[%s776_s1 + $0xc4] ss:$8 sps:$4 sm:$0xff]   ;;  %v571_v52 = vld [vmem:[%s776_s1 + $0xb4] ss:$8 sps:$4 sm:$0xff]  }
   0xf   :  { %375 = vmatpush1.bf16.msra.mxu0 %v531_v8  ;;  %v124_v42 = vcombine.high %v116_v40, %v116_v40  ;;  %v123_v50 = vrot.slane %v109_v46, %v115_v34  ;;  %v569_v51 = vld [vmem:[%s776_s1 + $0xc0] ss:$8 sps:$4 sm:$0xff]   ;;  %v575_v53 = vld [vmem:[%s776_s1 + $0xb0] ss:$8 sps:$4 sm:$0xff]   ;;  %v577_v54 = vld [vmem:[%s776_s1 + $0xa4] ss:$8 sps:$4 sm:$0xff]  }
  0x10   :  { %376 = vmatprep.subr.bf16.mxu0 %v532_v11  ;;  %v581_v55 = vld [vmem:[%s776_s1 + $0xa0] ss:$8 sps:$4 sm:$0xff]   ;;  %v583_v56 = vld [vmem:[%s776_s1 + $0x94] ss:$8 sps:$4 sm:$0xff]   ;;  %v587_v57 = vld [vmem:[%s776_s1 + $0x90] ss:$8 sps:$4 sm:$0xff]  }
  0x11   :  { %416 = vmatpush1.bf16.msra.mxu1 %v564_v25  ;;  %400 = vmatprep.mubr.bf16.mxu0 %v124_v42  ;;  %v589_v58 = vld [vmem:[%s776_s1 + $0x84] ss:$8 sps:$4 sm:$0xff]   ;;  %v592_v59 = vld [vmem:[%s776_s1 + $0x80] ss:$8 sps:$4 sm:$0xff]   ;;  %v72_v0 = vsub.s32 0, %v687_v28  ;;  %v90_v1 = vsub.s32 1, %v687_v28 }
  0x12   :  { %417 = vmatprep.subr.bf16.mxu1 %v567_v26  ;;  %v64_v2 = vld [vmem:[%s778_s2] sm:$0xf]  ;;  %v76_v3 = vsub.s32 2, %v687_v28  ;;  %v94_v4 = vsub.s32 3, %v687_v28  ;;  %v67_v7 = vand.u32 1, %v687_v28 }
  0x13   :  { %377 = vmatpush1.bf16.msra.mxu0 %v534_v14  ;;  %v73_v5 = vrot.slane %v64_v2, %v72_v0  ;;  %v91_v6 = vrot.slane %v64_v2, %v90_v1 }
  0x14   :  { %378 = vmatprep.subr.bf16.mxu0 %v535_v15  ;;  %v77_v8 = vrot.slane %v64_v2, %v76_v3  ;;  %v95_v9 = vrot.slane %v64_v2, %v94_v4  ;;  %vm68_vm0 = vcmp.eq.s32.totalorder %v67_v7, 0 }
  0x15   :  { %418 = vmatpush1.bf16.msra.mxu1 %v570_v30  ;;  %v83_v10 = vrot.slane %v73_v5, %v72_v0  ;;  %v101_v11 = vrot.slane %v91_v6, %v90_v1 }
  0x16   :  { %419 = vmatprep.subr.bf16.mxu1 %v573_v32  ;;  %v87_v12 = vrot.slane %v77_v8, %v72_v0  ;;  %v105_v13 = vrot.slane %v95_v9, %v90_v1 }
  0x17   :  { %379 = vmatpush1.bf16.msra.mxu0 %v537_v18  ;;  %v106_v14 = vsel %vm68_vm0, %v83_v10, %v101_v11 }
  0x18   :  { %380 = vmatprep.subr.bf16.mxu0 %v538_v20  ;;  %v107_v16 = vsel %vm68_vm0, %v87_v12, %v105_v13 }
  0x19   :  { %420 = vmatpush1.bf16.msra.mxu1 %v576_v36 }
  0x1a   :  { %421 = vmatprep.subr.bf16.mxu1 %v579_v37 }
  0x1b   :  { %381 = vmatpush1.bf16.msra.mxu0 %v540_v24 }
  0x1c   :  { %382 = vmatprep.subr.bf16.mxu0 %v541_v27 }
  0x1d   :  { %422 = vmatpush1.bf16.msra.mxu1 %v582_v41 }
  0x1e   :  { %423 = vmatprep.subr.bf16.mxu1 %v585_v44 }
  0x1f   :  { %383 = vmatpush1.bf16.msra.mxu0 %v545_v31 }
  0x20   :  { %384 = vmatprep.subr.bf16.mxu0 %v547_v33 }
  0x21   :  { %424 = vmatpush1.bf16.msra.mxu1 %v588_v47 }
  0x23   :  { %385 = vmatpush2.bf16.msra.mxu0 %v551_v35 }
  0x24   :  { %386 = vmatprep.subr.bf16.mxu0 %v553_v39  ;;  %442 = vmatmul.mubr.bf16.vlgmr.msra.gmra.mxu1 %v123_v50 }
  0x27   :  { %387 = vmatpush2.bf16.msra.mxu0 %v557_v43 }
  0x28   :  { %388 = vmatprep.subr.bf16.mxu0 %v559_v45 }
  0x2b   :  { %389 = vmatpush2.bf16.msra.mxu0 %v563_v48 }
  0x2c   :  { %390 = vmatprep.subr.bf16.mxu0 %v565_v49 }
  0x2f   :  { %391 = vmatpush2.bf16.msra.mxu0 %v569_v51 }
  0x30   :  { %392 = vmatprep.subr.bf16.mxu0 %v571_v52 }
  0x33   :  { %393 = vmatpush2.bf16.msra.mxu0 %v575_v53 }
  0x34   :  { %394 = vmatprep.subr.bf16.mxu0 %v577_v54 }
  0x37   :  { %395 = vmatpush2.bf16.msra.mxu0 %v581_v55 }
  0x38   :  { %396 = vmatprep.subr.bf16.mxu0 %v583_v56 }
  0x3b   :  { %397 = vmatpush2.bf16.msra.mxu0 %v587_v57 }
  0x3c   :  { %398 = vmatprep.subr.bf16.mxu0 %v589_v58 }
  0x3f   :  { %399 = vmatpush2.bf16.msra.mxu0 %v592_v59 }
  0x42   :  { %401 = vmatmul.mubr.bf16.vlgmr.msra.gmra.mxu0 %v116_v40 }
  0xe4   :  { %v443_v60 = vpop.f32.mrf.mxu1 }
  0xe6   :  { %v445_v61 = vpop.f32.mrf.mxu1 }
  0xe8   :  { %v447_v62 = vpop.f32.mrf.mxu1 }
  0xea   :  { %v448_v63 = vpop.f32.mrf.mxu1 }
 0x102   :  { %v402_v15 = vpop.f32.mrf.mxu0 }
 0x103   :  { %v403_v17 = vadd.f32 %v402_v15, %v106_v14 }
 0x104   :  { %v404_v18 = vpop.f32.mrf.mxu0 }
 0x105   :  { %v405_v19 = vadd.f32 %v404_v18, %v107_v16  ;;  %v444_v21 = vadd.f32 %v443_v60, %v403_v17 }
 0x106   :  { %v406_v20 = vpop.f32.mrf.mxu0 }
 0x107   :  { %v446_v22 = vadd.f32 %v445_v61, %v405_v19 }
 0x108   :  { %v407_v23 = vpop.f32.mrf.mxu0 }
 0x109   :  { %v516_v24 = vpack.c.bf16 %v446_v22, %v444_v21 }
 0x10b   :  { %517 = vst.sshfl [vmem:[%s779_s3] sm:$0x33 pattern:$0x76325410] %v516_v24 }

</bundles_post_ra>
